<compile_context>
chip_gen: v7x
topology: tpu7x:2x2x1
jax: 0.10.0
libtpu: 0.0.40
codegen_flags: <defaults>
</compile_context>

<pallas_src>
import functools

import jax
import jax.numpy as jnp
from jax import lax
from jax.experimental import pallas as pl
from jax.experimental.pallas import tpu as pltpu


def _round_up(x, m):
    return ((x + m - 1) // m) * m


def _triplet_kernel(xr_ref, xct_ref, sqa_ref, sqch_ref, ta_ref, tc_ref,
                    hinge_ref, ap_acc, an_acc, *, margin):
    j = pl.program_id(1)

    @pl.when(j == 0)
    def _init():
        ap_acc[...] = jnp.full(ap_acc.shape, -jnp.inf, dtype=ap_acc.dtype)
        an_acc[...] = jnp.full(an_acc.shape, jnp.inf, dtype=an_acc.dtype)

    # Canonical (TM, K) x (K, TN) matmul on the MXU, f32 accumulation.
    gram = jnp.dot(xr_ref[...], xct_ref[...], preferred_element_type=jnp.float32)

    # Monotone surrogate of the squared distance for a fixed anchor row:
    #   dist^2 = ||a||^2 + 2 * (0.5*||c||^2 - a.c)  ==>  mine on score directly.
    score = sqch_ref[...] - gram                       # (TM, TN)
    same = ta_ref[...] == tc_ref[...]                  # (TM, TN); padded cols never match

    pos = jnp.where(same, score, -jnp.inf)             # hardest-positive candidates
    neg = jnp.where(same, jnp.inf, score)              # hardest-negative candidates
    ap_acc[...] = jnp.maximum(ap_acc[...], jnp.max(pos, axis=1, keepdims=True))
    an_acc[...] = jnp.minimum(an_acc[...], jnp.min(neg, axis=1, keepdims=True))

    @pl.when(j == pl.num_programs(1) - 1)
    def _finalize():
        # sqrt(clamp) is monotone => applying it to the mined extrema is exactly
        # equivalent to mining on sqrt(clamp(dist^2)) like the PyTorch module.
        sqa = sqa_ref[...]
        dist_ap = jnp.sqrt(jnp.maximum(sqa + 2.0 * ap_acc[...], 1e-12))
        dist_an = jnp.sqrt(jnp.maximum(sqa + 2.0 * an_acc[...], 1e-12))
        hinge_ref[...] = jnp.maximum(dist_ap - dist_an + jnp.float32(margin), 0.0)


def triplet_loss(inputs, targets, margin=0.3, *, block_m=256, block_n=512,
                 feature_dtype=jnp.bfloat16, vmem_limit_bytes=32 * 1024 * 1024):
    """inputs: (N, D) float features; targets: (N,) int labels. Returns scalar loss.

    feature_dtype=jnp.bfloat16 (default) streams features in bf16 (f32 Gram accumulation,
    f32 norms); pass jnp.float32 for bit-tight agreement with an f32 reference.
    """
    x32 = jnp.asarray(inputs, jnp.float32)
    targets = jnp.asarray(targets, jnp.int32)
    n, d = x32.shape

    # Exact f32 squared norms from the original features (computed once).
    sq = jnp.sum(x32 * x32, axis=1, keepdims=True)              # (n, 1)

    # Pad D to a lane multiple; zero columns change neither dots nor norms.
    d_pad = _round_up(d, 128)
    xf = jnp.pad(x32, ((0, 0), (0, d_pad - d))).astype(feature_dtype)

    # Tile sizes: TM multiple of 16 (bf16 sublane-pack safe), TN multiple of 128.
    rows = _round_up(n, 16)
    tm = max(16, _round_up(min(block_m, rows), 16))
    if rows >= 32 and rows // tm < 2:
        tm = _round_up((rows + 1) // 2, 16)     # >= 2 row blocks (v7x: 2 TensorCores)
    tn = max(128, _round_up(min(block_n, _round_up(n, 128)), 128))

    # Decoupled row/column padding keeps padding waste small.
    n_pad_m = _round_up(n, tm)
    n_pad_n = _round_up(n, tn)

    sentinel = jnp.iinfo(jnp.int32).min          # cannot appear as a real label
    big = jnp.float32(1e30)                      # large *finite* poison (no inf-inf NaN)

    # Row-side (anchor) operands.
    x_rows = jnp.pad(xf, ((0, n_pad_m - n), (0, 0)))                       # (Nm, Dp)
    sqa = jnp.pad(sq, ((0, n_pad_m - n), (0, 0)))                          # (Nm, 1)
    ta = jnp.pad(targets, (0, n_pad_m - n),
                 constant_values=sentinel).reshape(n_pad_m, 1)             # (Nm, 1)

    # Column-side (candidate) operands, pre-transposed and poisoned where padded.
    x_cols_t = jnp.pad(xf, ((0, n_pad_n - n), (0, 0))).T                   # (Dp, Nn)
    sqc_half = jnp.pad(0.5 * sq[:, 0], (0, n_pad_n - n),
                       constant_values=big).reshape(1, n_pad_n)            # (1, Nn)
    tc = jnp.pad(targets, (0, n_pad_n - n),
                 constant_values=sentinel).reshape(1, n_pad_n)             # (1, Nn)

    grid = (n_pad_m // tm, n_pad_n // tn)
    kernel = functools.partial(_triplet_kernel, margin=float(margin))

    hinge = pl.pallas_call(
        kernel,
        out_shape=jax.ShapeDtypeStruct((n_pad_m, 1), jnp.float32),
        grid_spec=pltpu.PrefetchScalarGridSpec(
            num_scalar_prefetch=0,
            grid=grid,
            in_specs=[
                pl.BlockSpec((tm, d_pad), lambda i, j: (i, 0)),   # anchor features
                pl.BlockSpec((d_pad, tn), lambda i, j: (0, j)),   # candidate features^T
                pl.BlockSpec((tm, 1), lambda i, j: (i, 0)),       # ||a||^2   (f32)
                pl.BlockSpec((1, tn), lambda i, j: (0, j)),       # 0.5*||c||^2 (f32)
                pl.BlockSpec((tm, 1), lambda i, j: (i, 0)),       # anchor labels
                pl.BlockSpec((1, tn), lambda i, j: (0, j)),       # candidate labels
            ],
            out_specs=pl.BlockSpec((tm, 1), lambda i, j: (i, 0)),
            scratch_shapes=[pltpu.VMEM((tm, 1), jnp.float32),     # running max (pos)
                            pltpu.VMEM((tm, 1), jnp.float32)],    # running min (neg)
        ),
        compiler_params=pltpu.CompilerParams(
            dimension_semantics=("parallel", "arbitrary"),
            vmem_limit_bytes=vmem_limit_bytes,
        ),
    )(x_rows, x_cols_t, sqa, sqc_half, ta, tc)

    # Mean over the true N anchors only (padded rows sliced off).
    return jnp.mean(hinge[:n, 0])


def _triplet_loss_ref(inputs, targets, margin=0.3):
    """Plain-JAX reference mirroring the PyTorch module (f32 everywhere)."""
    x = inputs.astype(jnp.float32)
    sq = jnp.sum(x * x, axis=1, keepdims=True)
    gram = lax.dot_general(x, x, dimension_numbers=(((1,), (1,)), ((), ())),
                           precision=lax.Precision.HIGHEST,
                           preferred_element_type=jnp.float32)
    dist = jnp.sqrt(jnp.maximum(sq + sq.T - 2.0 * gram, 1e-12))
    mask = targets[:, None] == targets[None, :]
    dist_ap = jnp.max(jnp.where(mask, dist, -jnp.inf), axis=1)
    dist_an = jnp.min(jnp.where(mask, jnp.inf, dist), axis=1)
    return jnp.mean(jnp.maximum(dist_ap - dist_an + margin, 0.0))


if __name__ == "__main__":
    key = jax.random.PRNGKey(0)

    # Test 1: small case, single grid step, f32 feature path (tight tolerance).
    n1, d1 = 8, 32
    x1 = jax.random.normal(key, (n1, d1), dtype=jnp.float32)
    t1 = jnp.array([0, 0, 1, 1, 2, 2, 3, 3], dtype=jnp.int32)
    loss1 = triplet_loss(x1, t1, margin=0.3, feature_dtype=jnp.float32)
    jax.block_until_ready(loss1)
    ref1 = _triplet_loss_ref(x1, t1, margin=0.3)
    assert jnp.isfinite(loss1), "loss1 is not finite"
    assert jnp.allclose(loss1, ref1, rtol=1e-4, atol=1e-5), (loss1, ref1)

    # Test 2: multi-block grid (row-parallel + column accumulation) with decoupled
    # row/column padding and poisoned padded candidates; f32 path, tight tolerance.
    n2, d2 = 200, 64
    x2 = jax.random.normal(jax.random.PRNGKey(1), (n2, d2), dtype=jnp.float32)
    t2 = (jnp.arange(n2) % 25).astype(jnp.int32)
    loss2 = triplet_loss(x2, t2, margin=0.3, block_m=64, block_n=128,
                         feature_dtype=jnp.float32)
    jax.block_until_ready(loss2)
    ref2 = _triplet_loss_ref(x2, t2, margin=0.3)
    assert jnp.isfinite(loss2), "loss2 is not finite"
    assert jnp.allclose(loss2, ref2, rtol=1e-4, atol=1e-5), (loss2, ref2)

    # Test 3: default (bf16-feature) fast path against the f32 reference; the bf16
    # Gram perturbs the mined distances slightly, so use a looser tolerance.
    loss3 = triplet_loss(x2, t2, margin=0.3)   # defaults: bf16 features, 256x512 tiles
    jax.block_until_ready(loss3)
    assert jnp.isfinite(loss3), "loss3 is not finite"
    assert jnp.allclose(loss3, ref2, rtol=3e-2, atol=3e-2), (loss3, ref2)

    print("KERNEL_OK")
</pallas_src>

<mosaic_0001>
module attributes {stable_mosaic.version = 11 : i64} {
  func.func @_triplet_kernel(%arg0: i32, %arg1: i32, %arg2: memref<16x128xf32, #tpu.memory_space<vmem>>, %arg3: memref<128x128xf32, #tpu.memory_space<vmem>>, %arg4: memref<16x1xf32, #tpu.memory_space<vmem>>, %arg5: memref<1x128xf32, #tpu.memory_space<vmem>>, %arg6: memref<16x1xi32, #tpu.memory_space<vmem>>, %arg7: memref<1x128xi32, #tpu.memory_space<vmem>>, %arg8: memref<16x1xf32, #tpu.memory_space<vmem>>, %arg9: memref<16x1xf32, #tpu.memory_space<vmem>>, %arg10: memref<16x1xf32, #tpu.memory_space<vmem>>) attributes {dimension_semantics = [#tpu.dimension_semantics<parallel>, #tpu.dimension_semantics<arbitrary>], iteration_bounds = array<i64: 1, 1>, scalar_prefetch = 0 : i64, scratch_operands = 2 : i64, tpu.core_type = #tpu.core_type<tc>, window_params = [{transform_indices = @transform_0, window_bounds = array<i64: 16, 128>}, {transform_indices = @transform_1, window_bounds = array<i64: 128, 128>}, {transform_indices = @transform_2, window_bounds = array<i64: 16, 1>}, {transform_indices = @transform_3, window_bounds = array<i64: 1, 128>}, {transform_indices = @transform_4, window_bounds = array<i64: 16, 1>}, {transform_indices = @transform_5, window_bounds = array<i64: 1, 128>}, {transform_indices = @transform_6, window_bounds = array<i64: 16, 1>}]} {
    %c0_i32 = arith.constant 0 : i32
    %0 = arith.cmpi eq, %arg1, %c0_i32 : i32
    %1 = arith.extui %0 : i1 to i32
    %c0_i32_0 = arith.constant 0 : i32
    %2 = arith.cmpi ne, %1, %c0_i32_0 : i32
    scf.if %2 {
      %cst_24 = arith.constant 0xFF800000 : f32
      %31 = vector.broadcast %cst_24 : f32 to vector<16x1xf32>
      %c0_25 = arith.constant 0 : index
      %c0_26 = arith.constant 0 : index
      %32 = vector.load %arg9[%c0_25, %c0_26] : memref<16x1xf32, #tpu.memory_space<vmem>>, vector<16x1xf32>
      tpu.vector_store %arg9[%c0_25, %c0_26], %31 {strides = array<i32>} : memref<16x1xf32, #tpu.memory_space<vmem>>, vector<16x1xf32>,
      %cst_27 = arith.constant 0x7F800000 : f32
      %33 = vector.broadcast %cst_27 : f32 to vector<16x1xf32>
      %c0_28 = arith.constant 0 : index
      %c0_29 = arith.constant 0 : index
      %34 = vector.load %arg10[%c0_28, %c0_29] : memref<16x1xf32, #tpu.memory_space<vmem>>, vector<16x1xf32>
      tpu.vector_store %arg10[%c0_28, %c0_29], %33 {strides = array<i32>} : memref<16x1xf32, #tpu.memory_space<vmem>>, vector<16x1xf32>,
    } else {
    }
    %c0 = arith.constant 0 : index
    %c0_1 = arith.constant 0 : index
    %3 = vector.load %arg2[%c0, %c0_1] : memref<16x128xf32, #tpu.memory_space<vmem>>, vector<16x128xf32>
    %c0_2 = arith.constant 0 : index
    %c0_3 = arith.constant 0 : index
    %4 = vector.load %arg3[%c0_2, %c0_3] : memref<128x128xf32, #tpu.memory_space<vmem>>, vector<128x128xf32>
    %cst = arith.constant dense<0.000000e+00> : vector<16x128xf32>
    %5 = tpu.matmul %3, %4, %cst {dimension_numbers = #tpu.dot_dimension_numbers<[1], [0], [0], [1], [0, 0, 1, 1], [], []>} : vector<16x128xf32>, vector<128x128xf32>, vector<16x128xf32> -> vector<16x128xf32>
    %c0_4 = arith.constant 0 : index
    %c0_5 = arith.constant 0 : index
    %6 = vector.load %arg5[%c0_4, %c0_5] : memref<1x128xf32, #tpu.memory_space<vmem>>, vector<1x128xf32>
    %7 = vector.broadcast %6 : vector<1x128xf32> to vector<16x128xf32>
    %8 = arith.subf %7, %5 : vector<16x128xf32>
    %c0_6 = arith.constant 0 : index
    %c0_7 = arith.constant 0 : index
    %9 = vector.load %arg6[%c0_6, %c0_7] : memref<16x1xi32, #tpu.memory_space<vmem>>, vector<16x1xi32>
    %c0_8 = arith.constant 0 : index
    %c0_9 = arith.constant 0 : index
    %10 = vector.load %arg7[%c0_8, %c0_9] : memref<1x128xi32, #tpu.memory_space<vmem>>, vector<1x128xi32>
    %11 = vector.broadcast %9 : vector<16x1xi32> to vector<16x128xi32>
    %12 = vector.broadcast %10 : vector<1x128xi32> to vector<16x128xi32>
    %13 = arith.cmpi eq, %11, %12 : vector<16x128xi32>
    %cst_10 = arith.constant 0xFF800000 : f32
    %14 = vector.broadcast %cst_10 : f32 to vector<16x128xf32>
    %15 = arith.select %13, %8, %14 : vector<16x128xi1>, vector<16x128xf32>
    %cst_11 = arith.constant 0x7F800000 : f32
    %16 = vector.broadcast %cst_11 : f32 to vector<16x128xf32>
    %17 = arith.select %13, %16, %8 : vector<16x128xi1>, vector<16x128xf32>
    %c0_12 = arith.constant 0 : index
    %c0_13 = arith.constant 0 : index
    %18 = vector.load %arg9[%c0_12, %c0_13] : memref<16x1xf32, #tpu.memory_space<vmem>>, vector<16x1xf32>
    %cst_14 = arith.constant dense<0xFF800000> : vector<16xf32>
    %19 = vector.multi_reduction <maximumf>, %15, %cst_14 [1] : vector<16x128xf32> to vector<16xf32>
    %20 = vector.shape_cast %19 : vector<16xf32> to vector<16x1xf32>
    %21 = arith.maximumf %18, %20 : vector<16x1xf32>
    %c0_15 = arith.constant 0 : index
    %c0_16 = arith.constant 0 : index
    %22 = vector.load %arg9[%c0_15, %c0_16] : memref<16x1xf32, #tpu.memory_space<vmem>>, vector<16x1xf32>
    tpu.vector_store %arg9[%c0_15, %c0_16], %21 {strides = array<i32>} : memref<16x1xf32, #tpu.memory_space<vmem>>, vector<16x1xf32>,
    %c0_17 = arith.constant 0 : index
    %c0_18 = arith.constant 0 : index
    %23 = vector.load %arg10[%c0_17, %c0_18] : memref<16x1xf32, #tpu.memory_space<vmem>>, vector<16x1xf32>
    %cst_19 = arith.constant dense<0x7F800000> : vector<16xf32>
    %24 = vector.multi_reduction <minimumf>, %17, %cst_19 [1] : vector<16x128xf32> to vector<16xf32>
    %25 = vector.shape_cast %24 : vector<16xf32> to vector<16x1xf32>
    %26 = arith.minimumf %23, %25 : vector<16x1xf32>
    %c0_20 = arith.constant 0 : index
    %c0_21 = arith.constant 0 : index
    %27 = vector.load %arg10[%c0_20, %c0_21] : memref<16x1xf32, #tpu.memory_space<vmem>>, vector<16x1xf32>
    tpu.vector_store %arg10[%c0_20, %c0_21], %26 {strides = array<i32>} : memref<16x1xf32, #tpu.memory_space<vmem>>, vector<16x1xf32>,
    %c0_i32_22 = arith.constant 0 : i32
    %28 = arith.cmpi eq, %arg1, %c0_i32_22 : i32
    %29 = arith.extui %28 : i1 to i32
    %c0_i32_23 = arith.constant 0 : i32
    %30 = arith.cmpi ne, %29, %c0_i32_23 : i32
    scf.if %30 {
      %c0_24 = arith.constant 0 : index
      %c0_25 = arith.constant 0 : index
      %31 = vector.load %arg4[%c0_24, %c0_25] : memref<16x1xf32, #tpu.memory_space<vmem>>, vector<16x1xf32>
      %c0_26 = arith.constant 0 : index
      %c0_27 = arith.constant 0 : index
      %32 = vector.load %arg9[%c0_26, %c0_27] : memref<16x1xf32, #tpu.memory_space<vmem>>, vector<16x1xf32>
      %cst_28 = arith.constant 2.000000e+00 : f32
      %33 = vector.broadcast %cst_28 : f32 to vector<16x1xf32>
      %34 = arith.mulf %33, %32 : vector<16x1xf32>
      %35 = arith.addf %31, %34 : vector<16x1xf32>
      %cst_29 = arith.constant 9.99999996E-13 : f32
      %36 = vector.broadcast %cst_29 : f32 to vector<16x1xf32>
      %37 = arith.maximumf %35, %36 : vector<16x1xf32>
      %38 = math.sqrt %37 : vector<16x1xf32>
      %c0_30 = arith.constant 0 : index
      %c0_31 = arith.constant 0 : index
      %39 = vector.load %arg10[%c0_30, %c0_31] : memref<16x1xf32, #tpu.memory_space<vmem>>, vector<16x1xf32>
      %cst_32 = arith.constant 2.000000e+00 : f32
      %40 = vector.broadcast %cst_32 : f32 to vector<16x1xf32>
      %41 = arith.mulf %40, %39 : vector<16x1xf32>
      %42 = arith.addf %31, %41 : vector<16x1xf32>
      %cst_33 = arith.constant 9.99999996E-13 : f32
      %43 = vector.broadcast %cst_33 : f32 to vector<16x1xf32>
      %44 = arith.maximumf %42, %43 : vector<16x1xf32>
      %45 = math.sqrt %44 : vector<16x1xf32>
      %46 = arith.subf %38, %45 : vector<16x1xf32>
      %cst_34 = arith.constant 3.000000e-01 : f32
      %47 = vector.broadcast %cst_34 : f32 to vector<16x1xf32>
      %48 = arith.addf %46, %47 : vector<16x1xf32>
      %cst_35 = arith.constant 0.000000e+00 : f32
      %49 = vector.broadcast %cst_35 : f32 to vector<16x1xf32>
      %50 = arith.maximumf %48, %49 : vector<16x1xf32>
      %c0_36 = arith.constant 0 : index
      %c0_37 = arith.constant 0 : index
      %51 = vector.load %arg8[%c0_36, %c0_37] : memref<16x1xf32, #tpu.memory_space<vmem>>, vector<16x1xf32>
      tpu.vector_store %arg8[%c0_36, %c0_37], %50 {strides = array<i32>} : memref<16x1xf32, #tpu.memory_space<vmem>>, vector<16x1xf32>,
    } else {
    }
    return
  }
  func.func @transform_0(%arg0: i32, %arg1: i32) -> (i32, i32) {
    %c0_i32 = arith.constant 0 : i32
    %c0_i32_0 = arith.constant 0 : i32
    return %arg0, %c0_i32 : i32, i32
  }
  func.func @transform_1(%arg0: i32, %arg1: i32) -> (i32, i32) {
    %c0_i32 = arith.constant 0 : i32
    %c0_i32_0 = arith.constant 0 : i32
    return %c0_i32, %arg1 : i32, i32
  }
  func.func @transform_2(%arg0: i32, %arg1: i32) -> (i32, i32) {
    %c0_i32 = arith.constant 0 : i32
    %c0_i32_0 = arith.constant 0 : i32
    return %arg0, %c0_i32 : i32, i32
  }
  func.func @transform_3(%arg0: i32, %arg1: i32) -> (i32, i32) {
    %c0_i32 = arith.constant 0 : i32
    %c0_i32_0 = arith.constant 0 : i32
    return %c0_i32, %arg1 : i32, i32
  }
  func.func @transform_4(%arg0: i32, %arg1: i32) -> (i32, i32) {
    %c0_i32 = arith.constant 0 : i32
    %c0_i32_0 = arith.constant 0 : i32
    return %arg0, %c0_i32 : i32, i32
  }
  func.func @transform_5(%arg0: i32, %arg1: i32) -> (i32, i32) {
    %c0_i32 = arith.constant 0 : i32
    %c0_i32_0 = arith.constant 0 : i32
    return %c0_i32, %arg1 : i32, i32
  }
  func.func @transform_6(%arg0: i32, %arg1: i32) -> (i32, i32) {
    %c0_i32 = arith.constant 0 : i32
    %c0_i32_0 = arith.constant 0 : i32
    return %arg0, %c0_i32 : i32, i32
  }
}

</mosaic_0001>

<bundles_post_ra>
// kernel: tpu_custom_call.1
= control target key start
LH: loop header
LB: loop body
LE: loop exit
PB: predicated region body
PF: predicated region fallthrough
CT: control target
= control target key end

     0   :  { %11 = vsyncpa [#allocation5], 0  ;;  %s376_s21 = smov [#allocation4]   ;;  %s469_s0 = inlined_call_operand.vmem [shape: f32[16,128], index: 0, kind: input, shape index: {}]   ;;  %s470_s1 = inlined_call_operand.hbm [shape: f32[128,128], index: 1, kind: input, shape index: {}]   ;;  %s471_s2 = inlined_call_operand.vmem [shape: f32[16,1], index: 2, kind: input, shape index: {}]   ;;  %s472_s3 = inlined_call_operand.vmem [shape: f32[1,128], index: 3, kind: input, shape index: {}]   ;;  %s473_s4 = inlined_call_operand.vmem [shape: s32[16,1], index: 4, kind: input, shape index: {}]   ;;  %s474_s5 = inlined_call_operand.vmem [shape: s32[1,128], index: 5, kind: input, shape index: {}]   ;;  %s475_s6 = inlined_call_operand.vmem [shape: f32[16,1], index: 6, kind: output, shape index: {}]  }
   0x1   :  { %s19_s22 = sshll.u32 %s376_s21, 4  ;;  %s352_s25 = scalar_lea.hbm %s470_s1, 2048  ;;  %s20_s22 = int_to_ptr.vmem [resolvable:$true] %s19_s22 }
   0x2   :  { %p353_p0 = scmp.ne.s32.totalorder %s470_s1, %s352_s25  ;;  %p356_p1 = scmp.lt.u32.totalorder %s352_s25, %s470_s1 }
   0x4   :  { %p358_p2 = pnand %p356_p1, %p353_p0 }
   0x6   :  { %361 = shalt.err (!%p358_p2)
}
   0x7   :  { %s362_s30 = scalar_lea.vmem %s20_s22, 2048  ;;  %p367_p4 = scmp.lt.s32.totalorder %s20_s22, %s20_s22 }
   0x8   :  { %p363_p3 = scmp.ne.s32.totalorder %s20_s22, %s362_s30  ;;  %p368_p5 = scmp.lt.s32.totalorder %s362_s30, %s362_s30 }
   0xa   :  { %p369_p6 = por %p368_p5, %p367_p4 }
   0xc   :  { %p370_p7 = pnand %p369_p6, %p363_p3 }
   0xe   :  { %373 = shalt.err (!%p370_p7)
}
   0xf   :  { %s377_s7 = smov 128   ;;  %s378_s8 = smov 8  }
  0x10   :  { %25 = dma.hbm_to_vmem [thread:$0]  %s470_s1, 2048, %s20_s22, [#allocation5], %s377_s7, %s377_s7, %s378_s8  }
  0x11   :  { %374 = dma.done.wait [#allocation5], 2048  }
  0x12   :  { %375 = vsyncadd [#allocation5], 4294965248  ;;  %v379_v0 = vmov 0   ;;  %v48_v1 = vld [vmem:[#allocation4] sm:$0xff]  ;;  %v49_v2 = vld [vmem:[#allocation4 + $0x8] sm:$0xff]  ;;  %vm41_vm0 = vcmask 7168  }
  0x13   :  { %343 = vset.pattern.permute.xlu0 %v379_v0  ;;  %v50_v3 = vld [vmem:[#allocation4 + $0x10] sm:$0xff]  ;;  %v305_v4 = vpack.c.bf16 %v49_v2, %v48_v1  ;;  %v51_v5 = vld [vmem:[#allocation4 + $0x18] sm:$0xff]  ;;  %v52_v7 = vld [vmem:[#allocation4 + $0x20] sm:$0xff]  ;;  %v380_v29 = vmov -inf   ;;  %v381_v42 = vmov inf  }
  0x14   :  { %v309_v6 = vpack.c.bf16 %v51_v5, %v50_v3  ;;  %v53_v8 = vld [vmem:[#allocation4 + $0x28] sm:$0xff]  ;;  %v46_v10 = vld [vmem:[%s469_s0] sm:$0xff]  ;;  %v54_v11 = vld [vmem:[#allocation4 + $0x30] sm:$0xff]  ;;  %43 = vst.msk [vmem:[#allocation2 + $0x8] sm:$0xff] %vm41_vm0, %v380_v29 }
  0x15   :  { %306 = vmatprep.subr.bf16.mxu0 %v305_v4  ;;  %v313_v9 = vpack.c.bf16 %v53_v8, %v52_v7  ;;  %v55_v12 = vld [vmem:[#allocation4 + $0x38] sm:$0xff]  ;;  %302 = vmatprep.mubr.f32.mxu0 %v46_v10  ;;  %v148_v13 = vld [vmem:[%s473_s4] sm:$0xff]  ;;  %v149_v14 = vld [vmem:[%s473_s4 + $0x8] sm:$0xff]  ;;  %42 = vst.msk [vmem:[#allocation2] sm:$0xff] %vm41_vm0, %v380_v29 }
  0x16   :  { %308 = vmatpush3.bf16.msra.mxu0 %v305_v4  ;;  %152 = vperm.xlu0 %343, %v148_v13   ;;  %v317_v15 = vpack.c.bf16 %v55_v12, %v54_v11  ;;  %v56_v16 = vld [vmem:[#allocation4 + $0x40] sm:$0xff]  ;;  %v57_v17 = vld [vmem:[#allocation4 + $0x48] sm:$0xff]  ;;  %v58_v19 = vld [vmem:[#allocation4 + $0x50] sm:$0xff]  ;;  %44 = vst.msk [vmem:[#allocation3] sm:$0xff] %vm41_vm0, %v381_v42 }
  0x17   :  { %310 = vmatprep.subr.bf16.mxu0 %v309_v6  ;;  %v321_v18 = vpack.c.bf16 %v57_v17, %v56_v16  ;;  %v59_v20 = vld [vmem:[#allocation4 + $0x58] sm:$0xff]  ;;  %v60_v22 = vld [vmem:[#allocation4 + $0x60] sm:$0xff]  ;;  %v61_v23 = vld [vmem:[#allocation4 + $0x68] sm:$0xff]  ;;  %45 = vst.msk [vmem:[#allocation3 + $0x8] sm:$0xff] %vm41_vm0, %v381_v42 }
  0x18   :  { %v325_v21 = vpack.c.bf16 %v59_v20, %v58_v19  ;;  %v329_v24 = vpack.c.bf16 %v61_v23, %v60_v22  ;;  %v62_v25 = vld [vmem:[#allocation4 + $0x70] sm:$0xff]  ;;  %v63_v26 = vld [vmem:[#allocation4 + $0x78] sm:$0xff]  ;;  %v47_v28 = vld [vmem:[%s469_s0 + $0x8] sm:$0xff] }
  0x19   :  { %v333_v27 = vpack.c.bf16 %v63_v26, %v62_v25  ;;  %v250_v31 = vld [vmem:[%s472_s3] ss:$0 sm:$0xff]  ;;  %v192_v55 = vld [vmem:[%s471_s2 + $0x8] sm:$0xff] }
  0x1a   :  { %312 = vmatpush3.bf16.msra.mxu0 %v309_v6  ;;  %155 = vperm.xlu0 %343, %v149_v14   ;;  %v251_v32 = vld [vmem:[%s474_s5] ss:$0 sm:$0xff] }
  0x1b   :  { %314 = vmatprep.subr.bf16.mxu0 %v313_v9  ;;  %v168_v43 = vld [vmem:[#allocation2 + $0x8] sm:$0xff]  ;;  %v191_v58 = vld [vmem:[%s471_s2] sm:$0xff] }
  0x1c   :  { %v167_v49 = vld [vmem:[#allocation2] sm:$0xff] }
  0x1d   :  { %v178_v44 = vld [vmem:[#allocation3] sm:$0xff] }
  0x1e   :  { %316 = vmatpush3.bf16.msra.mxu0 %v313_v9  ;;  %v179_v52 = vld [vmem:[#allocation3 + $0x8] sm:$0xff] }
  0x1f   :  { %318 = vmatprep.subr.bf16.mxu0 %v317_v15 }
  0x22   :  { %320 = vmatpush3.bf16.msra.mxu0 %v317_v15 }
  0x23   :  { %322 = vmatprep.subr.bf16.mxu0 %v321_v18 }
  0x26   :  { %324 = vmatpush3.bf16.msra.mxu0 %v321_v18 }
  0x27   :  { %326 = vmatprep.subr.bf16.mxu0 %v325_v21 }
  0x2a   :  { %328 = vmatpush3.bf16.msra.mxu0 %v325_v21 }
  0x2b   :  { %330 = vmatprep.subr.bf16.mxu0 %v329_v24 }
  0x2e   :  { %332 = vmatpush3.bf16.msra.mxu0 %v329_v24 }
  0x2f   :  { %334 = vmatprep.subr.bf16.mxu0 %v333_v27 }
  0x32   :  { %336 = vmatpush3.bf16.msra.mxu0 %v333_v27 }
  0x35   :  { %303 = vmatmul.mubr.f32.vlgmr.msra.gmra.mrb[0].mxu0 %v47_v28 }
  0x95   :  { %v153_v30 = vpop.permute.xlu0 %152 }
  0x96   :  { %vm161_vm2 = vcmp.eq.s32.totalorder %v153_v30, %v251_v32 }
  0x99   :  { %v156_v33 = vpop.permute.xlu0 %155 }
  0x9a   :  { %vm162_vm1 = vcmp.eq.s32.totalorder %v156_v33, %v251_v32 }
 0x108   :  { %v304_v34 = vpop.f32.mrb[0].mxu0 }
 0x109   :  { %v147_v35 = vsub.f32 %v250_v31, %v304_v34  ;;  %v130_v36 = vpop.f32.mrb[1].mxu0 }
 0x10a   :  { %v146_v37 = vsub.f32 %v250_v31, %v130_v36 }
 0x10b   :  { %v164_v38 = vsel %vm162_vm1, %v147_v35, -inf  ;;  %v166_v41 = vsel %vm162_vm1, inf, %v147_v35 }
 0x10c   :  { %171 = vmax.xlane.f32.xlu1 %v164_v38  ;;  %v165_v39 = vsel %vm161_vm2, inf, %v146_v37  ;;  %v163_v40 = vsel %vm161_vm2, %v146_v37, -inf }
 0x10d   :  { %180 = vmin.xlane.f32.xlu0 %v165_v39 }
 0x110   :  { %169 = vmax.xlane.f32.xlu1 %v163_v40 }
 0x114   :  { %182 = vmin.xlane.f32.xlu1 %v166_v41 }
 0x199   :  { %v172_v45 = vpop.xlane.xlu1 %171 }
 0x19a   :  { %v174_v46 = vmax.f32 %v168_v43, %v172_v45  ;;  %v181_v47 = vpop.xlane.xlu0 %180 }
 0x19b   :  { %v184_v48 = vmin.f32 %v178_v44, %v181_v47 }
 0x19c   :  { %177 = vst.msk [vmem:[#allocation2 + $0x8] sm:$0xff] %vm41_vm0, %v174_v46 }
 0x19d   :  { %186 = vst.msk [vmem:[#allocation3] sm:$0xff] %vm41_vm0, %v184_v48  ;;  %v170_v50 = vpop.xlane.xlu1 %169 }
 0x19e   :  { %v173_v51 = vmax.f32 %v167_v49, %v170_v50 }
 0x1a0   :  { %176 = vst.msk [vmem:[#allocation2] sm:$0xff] %vm41_vm0, %v173_v51 }
 0x1a1   :  { %v183_v53 = vpop.xlane.xlu1 %182 }
 0x1a2   :  { %v185_v54 = vmin.f32 %v179_v52, %v183_v53 }
 0x1a3   :  { %v194_v56 = vld [vmem:[#allocation2 + $0x8] sm:$0xff] }
 0x1a4   :  { %v196_v57 = vmul.f32 2.0, %v194_v56  ;;  %v215_v59 = vld [vmem:[#allocation3] sm:$0xff]  ;;  %187 = vst.msk [vmem:[#allocation3 + $0x8] sm:$0xff] %vm41_vm0, %v185_v54 }
 0x1a5   :  { %v217_v60 = vmul.f32 2.0, %v215_v59 }
 0x1a6   :  { %v198_v61 = vadd.f32 %v196_v57, %v192_v55 }
 0x1a7   :  { %v219_v62 = vadd.f32 %v217_v60, %v191_v58  ;;  %v193_v63 = vld [vmem:[#allocation2] sm:$0xff] }
 0x1a8   :  { %v195_v0 = vmul.f32 2.0, %v193_v63  ;;  %v200_v1 = vmax.f32 %v198_v61, 1e-12 }
 0x1a9   :  { %v221_v2 = vmax.f32 %v219_v62, 1e-12 }
 0x1aa   :  { %v197_v4 = vadd.f32 %v195_v0, %v191_v58  ;;  %vm210_vm5 = vcmp.eq.f32.partialorder %v200_v1, inf  ;;  %v213_v24 = vand.u32 2147483648, %v200_v1  ;;  %vm212_vm9 = vcmp.eq.f32.partialorder %v200_v1, 0.0 }
 0x1ab   :  { %344 = vrsqrt.f32 %v221_v2  ;;  %v216_v3 = vld [vmem:[#allocation3 + $0x8] sm:$0xff]  ;;  %vm225_vm3 = vcmp.eq.f32.partialorder %v221_v2, inf  ;;  %v228_v16 = vand.u32 2147483648, %v221_v2  ;;  %vm227_vm6 = vcmp.eq.f32.partialorder %v221_v2, 0.0 }
 0x1ac   :  { %v218_v5 = vmul.f32 2.0, %v216_v3  ;;  %346 = vrsqrt.f32 %v200_v1  ;;  %v199_v6 = vmax.f32 %v197_v4, 1e-12 }
 0x1ae   :  { %v220_v7 = vadd.f32 %v218_v5, %v192_v55  ;;  %348 = vrsqrt.f32 %v199_v6  ;;  %vm203_vm4 = vcmp.eq.f32.partialorder %v199_v6, inf  ;;  %v206_v17 = vand.u32 2147483648, %v199_v6 }
 0x1af   :  { %vm205_vm7 = vcmp.eq.f32.partialorder %v199_v6, 0.0 }
 0x1b0   :  { %v222_v8 = vmax.f32 %v220_v7, 1e-12 }
 0x1b2   :  { %350 = vrsqrt.f32 %v222_v8  ;;  %vm232_vm8 = vcmp.eq.f32.partialorder %v222_v8, inf  ;;  %v235_v26 = vand.u32 2147483648, %v222_v8  ;;  %vm234_vm10 = vcmp.eq.f32.partialorder %v222_v8, 0.0 }
 0x1b5   :  { %v345_v9 = vpop.eup %344 }
 0x1b6   :  { %v347_v10 = vpop.eup %346  ;;  %v224_v11 = vmul.f32 %v345_v9, %v221_v2 }
 0x1b7   :  { %v209_v13 = vmul.f32 %v347_v10, %v200_v1 }
 0x1b8   :  { %v349_v12 = vpop.eup %348  ;;  %v226_v14 = vsel %vm225_vm3, %v221_v2, %v224_v11 }
 0x1b9   :  { %v202_v15 = vmul.f32 %v349_v12, %v199_v6  ;;  %v211_v20 = vsel %vm210_vm5, %v200_v1, %v209_v13  ;;  %v229_v21 = vsel %vm227_vm6, %v228_v16, %v226_v14 }
 0x1ba   :  { %v214_v28 = vsel %vm212_vm9, %v213_v24, %v211_v20 }
 0x1bb   :  { %v204_v19 = vsel %vm203_vm4, %v199_v6, %v202_v15 }
 0x1bc   :  { %v351_v18 = vpop.eup %350  ;;  %v207_v22 = vsel %vm205_vm7, %v206_v17, %v204_v19 }
 0x1bd   :  { %v231_v23 = vmul.f32 %v351_v18, %v222_v8  ;;  %v237_v25 = vsub.f32 %v207_v22, %v229_v21 }
 0x1bf   :  { %v233_v27 = vsel %vm232_vm8, %v222_v8, %v231_v23  ;;  %v239_v29 = vadd.f32 0.3, %v237_v25 }
 0x1c0   :  { %v236_v30 = vsel %vm234_vm10, %v235_v26, %v233_v27 }
 0x1c1   :  { %v238_v31 = vsub.f32 %v214_v28, %v236_v30  ;;  %v241_v32 = vmax.f32 %v239_v29, 0.0 }
 0x1c3   :  { %v240_v33 = vadd.f32 0.3, %v238_v31  ;;  %243 = vst.msk [vmem:[%s475_s6] sm:$0xff] %vm41_vm0, %v241_v32 }
 0x1c5   :  { %v242_v34 = vmax.f32 %v240_v33, 0.0 }
 0x1c7   :  { %244 = vst.msk [vmem:[%s475_s6 + $0x8] sm:$0xff] %vm41_vm0, %v242_v34 }
 0x1c8   :  { %249 = vsyncpa [#allocation5], 1 }

</bundles_post_ra>
